<compile_context>
chip_gen: v7x
topology: tpu7x:2x2x1
jax: 0.10.0
libtpu: 0.0.40
codegen_flags: <defaults>
</compile_context>

<pallas_src>
import functools
import math

import jax
import jax.numpy as jnp
from jax.experimental import pallas as pl
from jax.experimental.pallas import tpu as pltpu


def _round_up(x, m):
    return ((x + m - 1) // m) * m


def sage_conv_kernel(adj_ref, hk_ref, hs_ref, ws_ref, wn_ref, b_ref,
                     o_ref, agg_ref, *, deg_col):
    k = pl.program_id(1)

    @pl.when(k == 0)
    def _init():
        agg_ref[...] = jnp.zeros_like(agg_ref)

    # --- neighbor aggregation: accumulate (tm, Fp) over the K (src-node) axis ---
    adj_tile = adj_ref[...].astype(jnp.float32)            # bf16 -> f32 ({0,1} exact)
    agg_ref[...] += jnp.dot(adj_tile, hk_ref[...],
                            preferred_element_type=jnp.float32)

    # --- finalize: mean normalize + fused linear over concat([h, h_N]) ---
    @pl.when(k == pl.num_programs(1) - 1)
    def _finalize():
        agg = agg_ref[...]                                  # (tm, Fp)
        deg = agg[:, deg_col:deg_col + 1]                   # (tm, 1), via ones column (MXU)
        inv_deg = jnp.where(deg > 0.0, 1.0 / deg, 0.0)      # 0 for isolated nodes
        h_n = agg * inv_deg                                 # (tm, Fp)
        out = (jnp.dot(hs_ref[...], ws_ref[...], preferred_element_type=jnp.float32)
               + jnp.dot(h_n, wn_ref[...], preferred_element_type=jnp.float32)
               + b_ref[...])                                # (tm, Op) + (1, Op)
        o_ref[...] = out.astype(o_ref.dtype)


def sage_conv(adj, h, w, b, *, tm=256, tk=256):
    """adj: (N, N) dense adjacency (adj[dst, src] = 1), h: (N, F),
    w: (2F, O) (nn.Linear weight transposed for right-multiply), b: (O,) -> (N, O)."""
    N, F = h.shape
    twoF, O = w.shape
    assert twoF == 2 * F

    # Lane-dense padded sizes; +1 feature column holds the all-ones "degree" feature.
    Fp = _round_up(F + 1, 128)
    Op = _round_up(O, 128)

    # Tile sizes: node tile tm (MXU rows), contraction tile tk (lane dim, x128).
    Nmin = _round_up(N, 128)
    tm = max(8, min(tm, Nmin))
    tk = max(128, min(tk, Nmin))
    assert tm % 8 == 0 and tk % 128 == 0
    Np = _round_up(N, math.lcm(tm, tk))

    # Padded operands. Padding rows/cols are zero, so they contribute nothing.
    adj_p = jnp.zeros((Np, Np), jnp.bfloat16).at[:N, :N].set(adj.astype(jnp.bfloat16))
    h_aug = (jnp.zeros((Np, Fp), jnp.float32)
             .at[:N, :F].set(h.astype(jnp.float32))
             .at[:N, F].set(1.0))                           # ones column -> degree
    w32 = w.astype(jnp.float32)
    ws_p = jnp.zeros((Fp, Op), jnp.float32).at[:F, :O].set(w32[:F, :])
    wn_p = jnp.zeros((Fp, Op), jnp.float32).at[:F, :O].set(w32[F:, :])
    b_p = jnp.zeros((1, Op), jnp.float32).at[0, :O].set(b.astype(jnp.float32))

    kernel = functools.partial(sage_conv_kernel, deg_col=F)

    # VMEM budget: double-buffered input/output tiles + accumulator scratch.
    vmem_bytes = (2 * (tm * tk * 2            # adj tile (bf16)
                       + tk * Fp * 4          # neighbor-feature K tile
                       + tm * Fp * 4          # self-feature tile
                       + 2 * Fp * Op * 4      # W_self, W_neigh
                       + Op * 4               # bias
                       + tm * Op * 4)         # output tile
                  + tm * Fp * 4)              # accumulator scratch
    vmem_limit = int(min(max(2 * vmem_bytes, 32 * 1024 * 1024), 48 * 1024 * 1024))

    out_p = pl.pallas_call(
        kernel,
        out_shape=jax.ShapeDtypeStruct((Np, Op), jnp.float32),
        grid_spec=pltpu.PrefetchScalarGridSpec(
            num_scalar_prefetch=0,
            grid=(Np // tm, Np // tk),
            in_specs=[
                pl.BlockSpec((tm, tk), lambda i, k: (i, k)),   # adjacency tile
                pl.BlockSpec((tk, Fp), lambda i, k: (k, 0)),   # neighbor features (K tile)
                pl.BlockSpec((tm, Fp), lambda i, k: (i, 0)),   # self features (node tile)
                pl.BlockSpec((Fp, Op), lambda i, k: (0, 0)),   # W_self
                pl.BlockSpec((Fp, Op), lambda i, k: (0, 0)),   # W_neigh
                pl.BlockSpec((1, Op), lambda i, k: (0, 0)),    # bias
            ],
            out_specs=pl.BlockSpec((tm, Op), lambda i, k: (i, 0)),
            scratch_shapes=[pltpu.VMEM((tm, Fp), jnp.float32)],
        ),
        compiler_params=pltpu.CompilerParams(
            dimension_semantics=("parallel", "arbitrary"),
            vmem_limit_bytes=vmem_limit),
    )(adj_p, h_aug, h_aug, ws_p, wn_p, b_p)

    return out_p[:N, :O]


def sage_conv_ref(adj, h, w, b):
    deg = jnp.sum(adj, axis=1, keepdims=True)
    agg = adj @ h
    h_n = jnp.where(deg > 0, agg / jnp.maximum(deg, 1.0), 0.0)
    h_total = jnp.concatenate([h, h_n], axis=1)
    return h_total @ w + b[None, :]


if __name__ == "__main__":
    # TODO(synk): DGL graph loading / CoraGraphDataset is replaced by a small
    # synthetic dense adjacency; only the SAGEConv forward math is kernelized.
    N = 32          # number of graph nodes
    IN_FEAT = 16
    OUT_FEAT = 8

    key = jax.random.PRNGKey(0)
    k_h, k_adj, k_w, k_b = jax.random.split(key, 4)

    # node features
    h = jax.random.normal(k_h, (N, IN_FEAT), dtype=jnp.float32)

    # random sparse directed graph as dense adjacency: adj[dst, src] = 1
    adj = (jax.random.uniform(k_adj, (N, N)) < 0.15).astype(jnp.float32)
    adj = adj * (1.0 - jnp.eye(N, dtype=jnp.float32))  # no self loops

    # deterministic nn.Linear(2*in_feat, out_feat) init (uniform +/- 1/sqrt(fan_in))
    bound = 1.0 / jnp.sqrt(jnp.float32(2 * IN_FEAT))
    w = jax.random.uniform(k_w, (2 * IN_FEAT, OUT_FEAT), minval=-bound, maxval=bound,
                           dtype=jnp.float32)
    b = jax.random.uniform(k_b, (OUT_FEAT,), minval=-bound, maxval=bound,
                           dtype=jnp.float32)

    out = sage_conv(adj, h, w, b)
    out = jax.block_until_ready(out)

    ref = sage_conv_ref(adj, h, w, b)
    assert out.shape == (N, OUT_FEAT)
    assert jnp.allclose(out, ref, atol=1e-4, rtol=1e-4), "mismatch vs JAX reference"

    print("KERNEL_OK")
</pallas_src>

<mosaic_0001>
module attributes {stable_mosaic.version = 11 : i64} {
  func.func @sage_conv_kernel(%arg0: i32, %arg1: i32, %arg2: memref<128x128xbf16, #tpu.memory_space<vmem>>, %arg3: memref<128x128xf32, #tpu.memory_space<vmem>>, %arg4: memref<128x128xf32, #tpu.memory_space<vmem>>, %arg5: memref<128x128xf32, #tpu.memory_space<vmem>>, %arg6: memref<128x128xf32, #tpu.memory_space<vmem>>, %arg7: memref<1x128xf32, #tpu.memory_space<vmem>>, %arg8: memref<128x128xf32, #tpu.memory_space<vmem>>, %arg9: memref<128x128xf32, #tpu.memory_space<vmem>>) attributes {dimension_semantics = [#tpu.dimension_semantics<parallel>, #tpu.dimension_semantics<arbitrary>], iteration_bounds = array<i64: 1, 1>, scalar_prefetch = 0 : i64, scratch_operands = 1 : i64, tpu.core_type = #tpu.core_type<tc>, window_params = [{transform_indices = @transform_0, window_bounds = array<i64: 128, 128>}, {transform_indices = @transform_1, window_bounds = array<i64: 128, 128>}, {transform_indices = @transform_2, window_bounds = array<i64: 128, 128>}, {pipeline_mode = #tpu.pipeline_mode<synchronous>, transform_indices = @transform_3, window_bounds = array<i64: 128, 128>}, {pipeline_mode = #tpu.pipeline_mode<synchronous>, transform_indices = @transform_4, window_bounds = array<i64: 128, 128>}, {pipeline_mode = #tpu.pipeline_mode<synchronous>, transform_indices = @transform_5, window_bounds = array<i64: 1, 128>}, {transform_indices = @transform_6, window_bounds = array<i64: 128, 128>}]} {
    %c0_i32 = arith.constant 0 : i32
    %0 = arith.cmpi eq, %arg1, %c0_i32 : i32
    %1 = arith.extui %0 : i1 to i32
    %c0_i32_0 = arith.constant 0 : i32
    %2 = arith.cmpi ne, %1, %c0_i32_0 : i32
    scf.if %2 {
      %cst_10 = arith.constant 0.000000e+00 : f32
      %13 = vector.broadcast %cst_10 : f32 to vector<128x128xf32>
      %c0_11 = arith.constant 0 : index
      %c0_12 = arith.constant 0 : index
      %14 = vector.load %arg9[%c0_11, %c0_12] : memref<128x128xf32, #tpu.memory_space<vmem>>, vector<128x128xf32>
      tpu.vector_store %arg9[%c0_11, %c0_12], %13 {strides = array<i32>} : memref<128x128xf32, #tpu.memory_space<vmem>>, vector<128x128xf32>,
    } else {
    }
    %c0 = arith.constant 0 : index
    %c0_1 = arith.constant 0 : index
    %3 = vector.load %arg2[%c0, %c0_1] : memref<128x128xbf16, #tpu.memory_space<vmem>>, vector<128x128xbf16>
    %4 = arith.extf %3 : vector<128x128xbf16> to vector<128x128xf32>
    %c0_2 = arith.constant 0 : index
    %c0_3 = arith.constant 0 : index
    %5 = vector.load %arg9[%c0_2, %c0_3] : memref<128x128xf32, #tpu.memory_space<vmem>>, vector<128x128xf32>
    %c0_4 = arith.constant 0 : index
    %c0_5 = arith.constant 0 : index
    %6 = vector.load %arg3[%c0_4, %c0_5] : memref<128x128xf32, #tpu.memory_space<vmem>>, vector<128x128xf32>
    %cst = arith.constant dense<0.000000e+00> : vector<128x128xf32>
    %7 = tpu.matmul %4, %6, %cst {dimension_numbers = #tpu.dot_dimension_numbers<[1], [0], [0], [1], [0, 0, 1, 1], [], []>} : vector<128x128xf32>, vector<128x128xf32>, vector<128x128xf32> -> vector<128x128xf32>
    %8 = arith.addf %5, %7 : vector<128x128xf32>
    %c0_6 = arith.constant 0 : index
    %c0_7 = arith.constant 0 : index
    %9 = vector.load %arg9[%c0_6, %c0_7] : memref<128x128xf32, #tpu.memory_space<vmem>>, vector<128x128xf32>
    tpu.vector_store %arg9[%c0_6, %c0_7], %8 {strides = array<i32>} : memref<128x128xf32, #tpu.memory_space<vmem>>, vector<128x128xf32>,
    %c0_i32_8 = arith.constant 0 : i32
    %10 = arith.cmpi eq, %arg1, %c0_i32_8 : i32
    %11 = arith.extui %10 : i1 to i32
    %c0_i32_9 = arith.constant 0 : i32
    %12 = arith.cmpi ne, %11, %c0_i32_9 : i32
    scf.if %12 {
      %c0_10 = arith.constant 0 : index
      %c0_11 = arith.constant 0 : index
      %13 = vector.load %arg9[%c0_10, %c0_11] : memref<128x128xf32, #tpu.memory_space<vmem>>, vector<128x128xf32>
      %14 = vector.extract_strided_slice %13 {offsets = [0, 16], sizes = [128, 1], strides = [1, 1]} : vector<128x128xf32> to vector<128x1xf32>
      %cst_12 = arith.constant 0.000000e+00 : f32
      %15 = vector.broadcast %cst_12 : f32 to vector<128x1xf32>
      %16 = arith.cmpf ogt, %14, %15 : vector<128x1xf32>
      %cst_13 = arith.constant 1.000000e+00 : f32
      %17 = vector.broadcast %cst_13 : f32 to vector<128x1xf32>
      %18 = arith.divf %17, %14 : vector<128x1xf32>
      %cst_14 = arith.constant 0.000000e+00 : f32
      %19 = vector.broadcast %cst_14 : f32 to vector<128x1xf32>
      %20 = arith.select %16, %18, %19 : vector<128x1xi1>, vector<128x1xf32>
      %21 = vector.broadcast %20 : vector<128x1xf32> to vector<128x128xf32>
      %22 = arith.mulf %13, %21 : vector<128x128xf32>
      %c0_15 = arith.constant 0 : index
      %c0_16 = arith.constant 0 : index
      %23 = vector.load %arg4[%c0_15, %c0_16] : memref<128x128xf32, #tpu.memory_space<vmem>>, vector<128x128xf32>
      %c0_17 = arith.constant 0 : index
      %c0_18 = arith.constant 0 : index
      %24 = vector.load %arg5[%c0_17, %c0_18] : memref<128x128xf32, #tpu.memory_space<vmem>>, vector<128x128xf32>
      %cst_19 = arith.constant dense<0.000000e+00> : vector<128x128xf32>
      %25 = tpu.matmul %23, %24, %cst_19 {dimension_numbers = #tpu.dot_dimension_numbers<[1], [0], [0], [1], [0, 0, 1, 1], [], []>} : vector<128x128xf32>, vector<128x128xf32>, vector<128x128xf32> -> vector<128x128xf32>
      %c0_20 = arith.constant 0 : index
      %c0_21 = arith.constant 0 : index
      %26 = vector.load %arg6[%c0_20, %c0_21] : memref<128x128xf32, #tpu.memory_space<vmem>>, vector<128x128xf32>
      %cst_22 = arith.constant dense<0.000000e+00> : vector<128x128xf32>
      %27 = tpu.matmul %22, %26, %cst_22 {dimension_numbers = #tpu.dot_dimension_numbers<[1], [0], [0], [1], [0, 0, 1, 1], [], []>} : vector<128x128xf32>, vector<128x128xf32>, vector<128x128xf32> -> vector<128x128xf32>
      %28 = arith.addf %25, %27 : vector<128x128xf32>
      %c0_23 = arith.constant 0 : index
      %c0_24 = arith.constant 0 : index
      %29 = vector.load %arg7[%c0_23, %c0_24] : memref<1x128xf32, #tpu.memory_space<vmem>>, vector<1x128xf32>
      %30 = vector.broadcast %29 : vector<1x128xf32> to vector<128x128xf32>
      %31 = arith.addf %28, %30 : vector<128x128xf32>
      %c0_25 = arith.constant 0 : index
      %c0_26 = arith.constant 0 : index
      %32 = vector.load %arg8[%c0_25, %c0_26] : memref<128x128xf32, #tpu.memory_space<vmem>>, vector<128x128xf32>
      tpu.vector_store %arg8[%c0_25, %c0_26], %31 {strides = array<i32>} : memref<128x128xf32, #tpu.memory_space<vmem>>, vector<128x128xf32>,
    } else {
    }
    return
  }
  func.func @transform_0(%arg0: i32, %arg1: i32) -> (i32, i32) {
    %c0_i32 = arith.constant 0 : i32
    return %arg0, %arg1 : i32, i32
  }
  func.func @transform_1(%arg0: i32, %arg1: i32) -> (i32, i32) {
    %c0_i32 = arith.constant 0 : i32
    %c0_i32_0 = arith.constant 0 : i32
    return %arg1, %c0_i32 : i32, i32
  }
  func.func @transform_2(%arg0: i32, %arg1: i32) -> (i32, i32) {
    %c0_i32 = arith.constant 0 : i32
    %c0_i32_0 = arith.constant 0 : i32
    return %arg0, %c0_i32 : i32, i32
  }
  func.func @transform_3(%arg0: i32, %arg1: i32) -> (i32, i32) {
    %c0_i32 = arith.constant 0 : i32
    %c0_i32_0 = arith.constant 0 : i32
    %c0_i32_1 = arith.constant 0 : i32
    return %c0_i32, %c0_i32_0 : i32, i32
  }
  func.func @transform_4(%arg0: i32, %arg1: i32) -> (i32, i32) {
    %c0_i32 = arith.constant 0 : i32
    %c0_i32_0 = arith.constant 0 : i32
    %c0_i32_1 = arith.constant 0 : i32
    return %c0_i32, %c0_i32_0 : i32, i32
  }
  func.func @transform_5(%arg0: i32, %arg1: i32) -> (i32, i32) {
    %c0_i32 = arith.constant 0 : i32
    %c0_i32_0 = arith.constant 0 : i32
    %c0_i32_1 = arith.constant 0 : i32
    return %c0_i32, %c0_i32_0 : i32, i32
  }
  func.func @transform_6(%arg0: i32, %arg1: i32) -> (i32, i32) {
    %c0_i32 = arith.constant 0 : i32
    %c0_i32_0 = arith.constant 0 : i32
    return %arg0, %c0_i32 : i32, i32
  }
}

</mosaic_0001>

<bundles_post_ra>
// kernel: tpu_custom_call.1
= control target key start
LH: loop header
LB: loop body
LE: loop exit
PB: predicated region body
PF: predicated region fallthrough
CT: control target
= control target key end

     0   :  { %11 = vsyncpa [#allocation4], 0  ;;  %s1809_s0 = inlined_call_operand.hbm [shape: bf16[128,128], index: 0, kind: input, shape index: {}]   ;;  %s1810_s1 = inlined_call_operand.hbm [shape: f32[128,128], index: 1, kind: input, shape index: {}]   ;;  %s1811_s2 = inlined_call_operand.hbm [shape: f32[128,128], index: 2, kind: input, shape index: {}]   ;;  %s1812_s3 = inlined_call_operand.hbm [shape: f32[128,128], index: 3, kind: input, shape index: {}]   ;;  %s1813_s4 = inlined_call_operand.hbm [shape: f32[128,128], index: 4, kind: input, shape index: {}]   ;;  %s1814_s5 = inlined_call_operand.vmem [shape: f32[1,128], index: 5, kind: input, shape index: {}]   ;;  %s1815_s6 = inlined_call_operand.hbm [shape: f32[128,128], index: 6, kind: output, shape index: {}]  }
   0x1   :  { %12 = vsyncpa [#allocation7], 0 }
   0x2   :  { %13 = vsyncpa [#allocation10], 0 }
   0x3   :  { %14 = vsyncpa [#allocation5], 0  ;;  %s1545_s21 = smov [#allocation6]   ;;  %s1405_s25 = scalar_lea.hbm %s1810_s1, 2048 }
   0x4   :  { %s32_s22 = sshll.u32 %s1545_s21, 4  ;;  %p1406_p0 = scmp.ne.s32.totalorder %s1810_s1, %s1405_s25  ;;  %s33_s22 = int_to_ptr.vmem [resolvable:$true] %s32_s22 }
   0x5   :  { %p1409_p1 = scmp.lt.u32.totalorder %s1405_s25, %s1810_s1 }
   0x7   :  { %p1411_p2 = pnand %p1409_p1, %p1406_p0 }
   0x9   :  { %1414 = shalt.err (!%p1411_p2)
}
   0xa   :  { %s1415_s30 = scalar_lea.vmem %s33_s22, 2048  ;;  %p1420_p4 = scmp.lt.s32.totalorder %s33_s22, %s33_s22 }
   0xb   :  { %p1416_p3 = scmp.ne.s32.totalorder %s33_s22, %s1415_s30  ;;  %p1421_p5 = scmp.lt.s32.totalorder %s1415_s30, %s1415_s30 }
   0xd   :  { %p1422_p6 = por %p1421_p5, %p1420_p4 }
   0xf   :  { %p1423_p7 = pnand %p1422_p6, %p1416_p3 }
  0x11   :  { %1426 = shalt.err (!%p1423_p7)
}
  0x12   :  { %s1546_s7 = smov 128   ;;  %s1547_s8 = smov 8  }
  0x13   :  { %38 = dma.hbm_to_vmem [thread:$0]  %s1810_s1, 2048, %s33_s22, [#allocation7], %s1546_s7, %s1546_s7, %s1547_s8  }
  0x14   :  { %s1548_s11 = smov [#allocation9]   ;;  %s1549_s13 = smov [#allocation3]  }
  0x15   :  { %s56_s12 = sshll.u32 %s1548_s11, 4  ;;  %s20_s14 = sshll.u32 %s1549_s13, 4  ;;  %s57_s12 = int_to_ptr.vmem [resolvable:$true] %s56_s12  ;;  %s21_s14 = int_to_ptr.vmem [resolvable:$true] %s20_s14 }
  0x16   :  { %s1427_s17 = scalar_lea.hbm %s1812_s3, 2048 }
  0x17   :  { %p1428_p8 = scmp.ne.s32.totalorder %s1812_s3, %s1427_s17  ;;  %p1431_p9 = scmp.lt.u32.totalorder %s1427_s17, %s1812_s3 }
  0x19   :  { %p1433_p10 = pnand %p1431_p9, %p1428_p8 }
  0x1b   :  { %1436 = shalt.err (!%p1433_p10)
}
  0x1c   :  { %s1437_s1 = scalar_lea.vmem %s57_s12, 2048  ;;  %p1442_p12 = scmp.lt.s32.totalorder %s57_s12, %s57_s12 }
  0x1d   :  { %p1438_p11 = scmp.ne.s32.totalorder %s57_s12, %s1437_s1  ;;  %p1443_p13 = scmp.lt.s32.totalorder %s1437_s1, %s1437_s1 }
  0x1f   :  { %p1444_p0 = por %p1443_p13, %p1442_p12 }
  0x21   :  { %p1445_p1 = pnand %p1444_p0, %p1438_p11 }
  0x23   :  { %1448 = shalt.err (!%p1445_p1)
}
  0x24   :  { %62 = dma.hbm_to_vmem [thread:$0]  %s1812_s3, 2048, %s57_s12, [#allocation10], %s1546_s7, %s1546_s7, %s1547_s8  }
  0x25   :  { %s1449_s26 = scalar_lea.hbm %s1809_s0, 1024 }
  0x26   :  { %p1450_p2 = scmp.ne.s32.totalorder %s1809_s0, %s1449_s26  ;;  %p1453_p3 = scmp.lt.u32.totalorder %s1449_s26, %s1809_s0 }
  0x28   :  { %p1455_p4 = pnand %p1453_p3, %p1450_p2 }
  0x2a   :  { %1458 = shalt.err (!%p1455_p4)
}
  0x2b   :  { %s1459_s9 = scalar_lea.vmem %s21_s14, 1024  ;;  %p1464_p6 = scmp.lt.s32.totalorder %s21_s14, %s21_s14 }
  0x2c   :  { %p1460_p5 = scmp.ne.s32.totalorder %s21_s14, %s1459_s9  ;;  %p1465_p7 = scmp.lt.s32.totalorder %s1459_s9, %s1459_s9 }
  0x2e   :  { %p1466_p8 = por %p1465_p7, %p1464_p6 }
  0x30   :  { %p1467_p9 = pnand %p1466_p8, %p1460_p5 }
  0x32   :  { %1470 = shalt.err (!%p1467_p9)
}
  0x33   :  { %s1550_s3 = smov 64   ;;  %s1551_s10 = smov 4  }
  0x34   :  { %26 = dma.hbm_to_vmem [thread:$0]  %s1809_s0, 1024, %s21_s14, [#allocation4], %s1550_s3, %s1550_s3, %s1551_s10  }
  0x35   :  { %s1552_s13 = smov [#allocation8]   ;;  %s1553_s16 = smov [#allocation11]  }
  0x36   :  { %s44_s15 = sshll.u32 %s1552_s13, 4  ;;  %s68_s17 = sshll.u32 %s1553_s16, 4  ;;  %s45_s15 = int_to_ptr.vmem [resolvable:$true] %s44_s15  ;;  %s69_s17 = int_to_ptr.vmem [resolvable:$true] %s68_s17 }
  0x37   :  { %s1471_s20 = scalar_lea.hbm %s1811_s2, 2048 }
  0x38   :  { %p1472_p10 = scmp.ne.s32.totalorder %s1811_s2, %s1471_s20  ;;  %p1475_p11 = scmp.lt.u32.totalorder %s1471_s20, %s1811_s2 }
  0x3a   :  { %p1477_p12 = pnand %p1475_p11, %p1472_p10 }
  0x3c   :  { %1480 = shalt.err (!%p1477_p12)
}
  0x3d   :  { %s1481_s0 = scalar_lea.vmem %s45_s15, 2048  ;;  %p1486_p0 = scmp.lt.s32.totalorder %s45_s15, %s45_s15 }
  0x3e   :  { %p1482_p13 = scmp.ne.s32.totalorder %s45_s15, %s1481_s0  ;;  %p1487_p1 = scmp.lt.s32.totalorder %s1481_s0, %s1481_s0 }
  0x40   :  { %p1488_p2 = por %p1487_p1, %p1486_p0 }
  0x42   :  { %p1489_p3 = pnand %p1488_p2, %p1482_p13 }
  0x44   :  { %1492 = shalt.err (!%p1489_p3)
}
  0x45   :  { %50 = dma.hbm_to_vmem [thread:$0]  %s1811_s2, 2048, %s45_s15, [#allocation7], %s1546_s7, %s1546_s7, %s1547_s8  }
  0x46   :  { %s1493_s27 = scalar_lea.hbm %s1813_s4, 2048 }
  0x47   :  { %p1494_p4 = scmp.ne.s32.totalorder %s1813_s4, %s1493_s27  ;;  %p1497_p5 = scmp.lt.u32.totalorder %s1493_s27, %s1813_s4 }
  0x49   :  { %p1499_p6 = pnand %p1497_p5, %p1494_p4 }
  0x4b   :  { %1502 = shalt.err (!%p1499_p6)
}
  0x4c   :  { %s1503_s3 = scalar_lea.vmem %s69_s17, 2048  ;;  %p1508_p8 = scmp.lt.s32.totalorder %s69_s17, %s69_s17 }
  0x4d   :  { %p1504_p7 = scmp.ne.s32.totalorder %s69_s17, %s1503_s3  ;;  %p1509_p9 = scmp.lt.s32.totalorder %s1503_s3, %s1503_s3 }
  0x4f   :  { %p1510_p10 = por %p1509_p9, %p1508_p8 }
  0x51   :  { %p1511_p11 = pnand %p1510_p10, %p1504_p7 }
  0x53   :  { %1514 = shalt.err (!%p1511_p11)
}
  0x54   :  { %74 = dma.hbm_to_vmem [thread:$0]  %s1813_s4, 2048, %s69_s17, [#allocation10], %s1546_s7, %s1546_s7, %s1547_s8  }
  0x55   :  { %1537 = dma.done.wait [#allocation4], 1024  }
  0x56   :  { %1538 = vsyncadd [#allocation4], 4294966272 }
  0x57   :  { %1539 = dma.done.wait [#allocation7], 4096  }
  0x58   :  { %1540 = vsyncadd [#allocation7], 4294963200 }
  0x59   :  { %1541 = dma.done.wait [#allocation10], 4096  }
  0x5a   :  { %1542 = vsyncadd [#allocation10], 4294963200  ;;  %v160_v0 = vld [vmem:[#allocation6] sm:$0xff]  ;;  %v161_v1 = vld [vmem:[#allocation6 + $0x8] sm:$0xff]  ;;  %v1554_v48 = vmov 16  }
  0x5b   :  { %v162_v2 = vld [vmem:[#allocation6 + $0x10] sm:$0xff]  ;;  %v1232_v3 = vpack.c.bf16 %v161_v1, %v160_v0  ;;  %v163_v4 = vld [vmem:[#allocation6 + $0x18] sm:$0xff]  ;;  %v164_v6 = vld [vmem:[#allocation6 + $0x20] sm:$0xff]  ;;  %1371 = vset.pattern.permute.xlu0 %v1554_v48  ;;  %1372 = vset.pattern.permute.xlu1 %v1554_v48 }
  0x5c   :  { %v1236_v5 = vpack.c.bf16 %v163_v4, %v162_v2  ;;  %v165_v7 = vld [vmem:[#allocation6 + $0x28] sm:$0xff]  ;;  %v930_v9 = vld [vmem:[#allocation3] sm:$0xff]   ;;  %v166_v10 = vld [vmem:[#allocation6 + $0x30] sm:$0xff] }
  0x5d   :  { %1233 = vmatprep.subr.bf16.mxu0 %v1232_v3  ;;  %v1240_v8 = vpack.c.bf16 %v165_v7, %v164_v6  ;;  %v167_v11 = vld [vmem:[#allocation6 + $0x38] sm:$0xff]  ;;  %v931_v12 = vunpack.c.l.bf16 %v930_v9  ;;  %v168_v14 = vld [vmem:[#allocation6 + $0x40] sm:$0xff]  ;;  %v169_v15 = vld [vmem:[#allocation6 + $0x48] sm:$0xff]  ;;  %v932_v27 = vunpack.c.h.bf16 %v930_v9 }
  0x5e   :  { %1235 = vmatpush3.bf16.msra.mxu0 %v1232_v3  ;;  %v1244_v13 = vpack.c.bf16 %v167_v11, %v166_v10  ;;  %v1248_v16 = vpack.c.bf16 %v169_v15, %v168_v14  ;;  %v170_v17 = vld [vmem:[#allocation6 + $0x50] sm:$0xff]  ;;  %v171_v18 = vld [vmem:[#allocation6 + $0x58] sm:$0xff]  ;;  %v172_v20 = vld [vmem:[#allocation6 + $0x60] sm:$0xff] }
  0x5f   :  { %1237 = vmatprep.subr.bf16.mxu0 %v1236_v5  ;;  %1096 = vmatprep.mubr.f32.mxu0 %v931_v12  ;;  %v1252_v19 = vpack.c.bf16 %v171_v18, %v170_v17  ;;  %v173_v21 = vld [vmem:[#allocation6 + $0x68] sm:$0xff]  ;;  %v174_v23 = vld [vmem:[#allocation6 + $0x70] sm:$0xff]  ;;  %v175_v24 = vld [vmem:[#allocation6 + $0x78] sm:$0xff] }
  0x60   :  { %v1256_v22 = vpack.c.bf16 %v173_v21, %v172_v20  ;;  %v1260_v25 = vpack.c.bf16 %v175_v24, %v174_v23  ;;  %v961_v26 = vld [vmem:[#allocation3 + $0x8] sm:$0xff]   ;;  %v962_v29 = vld [vmem:[#allocation3 + $0x10] sm:$0xff]   ;;  %v963_v32 = vld [vmem:[#allocation3 + $0x18] sm:$0xff]  }
  0x61   :  { %v935_v28 = vunpack.c.l.bf16 %v961_v26  ;;  %v936_v30 = vunpack.c.h.bf16 %v961_v26  ;;  %v939_v31 = vunpack.c.l.bf16 %v962_v29  ;;  %v940_v33 = vunpack.c.h.bf16 %v962_v29  ;;  %v964_v35 = vld [vmem:[#allocation3 + $0x20] sm:$0xff]   ;;  %v965_v38 = vld [vmem:[#allocation3 + $0x28] sm:$0xff]   ;;  %v966_v41 = vld [vmem:[#allocation3 + $0x30] sm:$0xff]  }
  0x62   :  { %1239 = vmatpush3.bf16.msra.mxu0 %v1236_v5  ;;  %v943_v34 = vunpack.c.l.bf16 %v963_v32  ;;  %v944_v36 = vunpack.c.h.bf16 %v963_v32  ;;  %v947_v37 = vunpack.c.l.bf16 %v964_v35  ;;  %v948_v39 = vunpack.c.h.bf16 %v964_v35  ;;  %v967_v44 = vld [vmem:[#allocation3 + $0x38] sm:$0xff]   ;;  %v564_v49 = vld [vmem:[#allocation11] sm:$0xff]  ;;  %v565_v50 = vld [vmem:[#allocation11 + $0x8] sm:$0xff] }
  0x63   :  { %1241 = vmatprep.subr.bf16.mxu0 %v1240_v8  ;;  %v951_v40 = vunpack.c.l.bf16 %v965_v38  ;;  %v952_v42 = vunpack.c.h.bf16 %v965_v38  ;;  %v955_v43 = vunpack.c.l.bf16 %v966_v41  ;;  %v956_v45 = vunpack.c.h.bf16 %v966_v41  ;;  %v548_v51 = vld [vmem:[#allocation9] sm:$0xff]  ;;  %v549_v53 = vld [vmem:[#allocation9 + $0x8] sm:$0xff]  ;;  %v566_v54 = vld [vmem:[#allocation11 + $0x10] sm:$0xff] }
  0x64   :  { %v959_v46 = vunpack.c.l.bf16 %v967_v44  ;;  %v960_v47 = vunpack.c.h.bf16 %v967_v44  ;;  %v1264_v52 = vpack.c.bf16 %v565_v50, %v564_v49  ;;  %v567_v55 = vld [vmem:[#allocation11 + $0x18] sm:$0xff]  ;;  %v1663_v56 = vpack.c.bf16 %v549_v53, %v548_v51  ;;  %v550_v58 = vld [vmem:[#allocation9 + $0x10] sm:$0xff]  ;;  %v568_v60 = vld [vmem:[#allocation11 + $0x20] sm:$0xff] }
  0x65   :  { %v1268_v57 = vpack.c.bf16 %v567_v55, %v566_v54  ;;  %v551_v59 = vld [vmem:[#allocation9 + $0x18] sm:$0xff]  ;;  %v569_v62 = vld [vmem:[#allocation11 + $0x28] sm:$0xff]  ;;  %v552_v63 = vld [vmem:[#allocation9 + $0x20] sm:$0xff] }
  0x66   :  { %1243 = vmatpush3.bf16.msra.mxu0 %v1240_v8  ;;  %1265 = vmatprep.subr.bf16.mxu1 %v1264_v52  ;;  %v1665_v61 = vpack.c.bf16 %v551_v59, %v550_v58  ;;  %v553_v0 = vld [vmem:[#allocation9 + $0x28] sm:$0xff]  ;;  %v1272_v1 = vpack.c.bf16 %v569_v62, %v568_v60  ;;  %v570_v3 = vld [vmem:[#allocation11 + $0x30] sm:$0xff]  ;;  %v571_v4 = vld [vmem:[#allocation11 + $0x38] sm:$0xff] }
  0x67   :  { %1245 = vmatprep.subr.bf16.mxu0 %v1244_v13  ;;  %1267 = vmatpush3.bf16.msra.mxu1 %v1264_v52  ;;  %v1670_v2 = vpack.c.bf16 %v553_v0, %v552_v63  ;;  %v554_v5 = vld [vmem:[#allocation9 + $0x30] sm:$0xff]  ;;  %v555_v6 = vld [vmem:[#allocation9 + $0x38] sm:$0xff]  ;;  %v1276_v7 = vpack.c.bf16 %v571_v4, %v570_v3  ;;  %v572_v9 = vld [vmem:[#allocation11 + $0x40] sm:$0xff] }
  0x68   :  { %1269 = vmatprep.subr.bf16.mxu1 %v1268_v57  ;;  %v1674_v8 = vpack.c.bf16 %v555_v6, %v554_v5  ;;  %v573_v10 = vld [vmem:[#allocation11 + $0x48] sm:$0xff]  ;;  %v556_v11 = vld [vmem:[#allocation9 + $0x40] sm:$0xff]  ;;  %v574_v15 = vld [vmem:[#allocation11 + $0x50] sm:$0xff] }
  0x69   :  { %v557_v12 = vld [vmem:[#allocation9 + $0x48] sm:$0xff]  ;;  %v558_v17 = vld [vmem:[#allocation9 + $0x50] sm:$0xff]  ;;  %v559_v18 = vld [vmem:[#allocation9 + $0x58] sm:$0xff] }
  0x6a   :  { %1247 = vmatpush3.bf16.msra.mxu0 %v1244_v13  ;;  %v1280_v13 = vpack.c.bf16 %v573_v10, %v572_v9  ;;  %v1678_v14 = vpack.c.bf16 %v557_v12, %v556_v11  ;;  %v1682_v20 = vpack.c.bf16 %v559_v18, %v558_v17  ;;  %v576_v21 = vld [vmem:[#allocation11 + $0x60] sm:$0xff]  ;;  %v561_v24 = vld [vmem:[#allocation9 + $0x68] sm:$0xff]  ;;  %v579_v38 = vld [vmem:[#allocation11 + $0x78] sm:$0xff] }
  0x6b   :  { %1249 = vmatprep.subr.bf16.mxu0 %v1248_v16  ;;  %1271 = vmatpush3.bf16.msra.mxu1 %v1268_v57  ;;  %v560_v23 = vld [vmem:[#allocation9 + $0x60] sm:$0xff]  ;;  %v533_v53 = vld [vmem:[#allocation8 + $0x8] sm:$0xff]  ;;  %v534_v59 = vld [vmem:[#allocation8 + $0x10] sm:$0xff] }
  0x6c   :  { %1273 = vmatprep.subr.bf16.mxu1 %v1272_v1  ;;  %v1686_v26 = vpack.c.bf16 %v561_v24, %v560_v23  ;;  %v532_v50 = vld [vmem:[#allocation8] sm:$0xff]  ;;  %v535_v63 = vld [vmem:[#allocation8 + $0x18] sm:$0xff]  ;;  %v537_v9 = vld [vmem:[#allocation8 + $0x28] sm:$0xff] }
  0x6d   :  { %v536_v5 = vld [vmem:[#allocation8 + $0x20] sm:$0xff]  ;;  %v539_v17 = vld [vmem:[#allocation8 + $0x38] sm:$0xff] }
  0x6e   :  { %1251 = vmatpush3.bf16.msra.mxu0 %v1248_v16  ;;  %v575_v16 = vld [vmem:[#allocation11 + $0x58] sm:$0xff] }
  0x6f   :  { %1253 = vmatprep.subr.bf16.mxu0 %v1252_v19  ;;  %1275 = vmatpush3.bf16.msra.mxu1 %v1272_v1 }
  0x70   :  { %1277 = vmatprep.subr.bf16.mxu1 %v1276_v7 }
  0x72   :  { %1255 = vmatpush3.bf16.msra.mxu0 %v1252_v19  ;;  %v1284_v19 = vpack.c.bf16 %v575_v16, %v574_v15  ;;  %v538_v15 = vld [vmem:[#allocation8 + $0x30] sm:$0xff] }
  0x73   :  { %1257 = vmatprep.subr.bf16.mxu0 %v1256_v22  ;;  %1279 = vmatpush3.bf16.msra.mxu1 %v1276_v7 }
  0x74   :  { %1281 = vmatprep.subr.bf16.mxu1 %v1280_v13 }
  0x76   :  { %1259 = vmatpush3.bf16.msra.mxu0 %v1256_v22  ;;  %v577_v22 = vld [vmem:[#allocation11 + $0x68] sm:$0xff] }
  0x77   :  { %1261 = vmatprep.subr.bf16.mxu0 %v1260_v25  ;;  %1283 = vmatpush3.bf16.msra.mxu1 %v1280_v13 }
  0x78   :  { %1285 = vmatprep.subr.bf16.mxu1 %v1284_v19 }
  0x7a   :  { %1263 = vmatpush3.bf16.msra.mxu0 %v1260_v25  ;;  %v1288_v25 = vpack.c.bf16 %v577_v22, %v576_v21 }
  0x7b   :  { %1297 = vmatprep.subr.bf16.mxu0 %v1663_v56  ;;  %1287 = vmatpush3.bf16.msra.mxu1 %v1284_v19 }
  0x7c   :  { %1289 = vmatprep.subr.bf16.mxu1 %v1288_v25 }
  0x7d   :  { %1097 = vmatmul.mubr.f32.vlgmr.msra.gmra.mrb[0].mxu0 %v932_v27 }
  0x7e   :  { %1099 = vmatprep.mubr.f32.mxu0 %v935_v28  ;;  %1299 = vmatpush3.bf16.msra.mxu0 %v1663_v56 }
  0x7f   :  { %1301 = vmatprep.subr.bf16.mxu0 %v1665_v61  ;;  %1291 = vmatpush3.bf16.msra.mxu1 %v1288_v25 }
  0x81   :  { %1100 = vmatmul.mubr.f32.gmra.mrb[2].mxu0 %v936_v30 }
  0x82   :  { %1102 = vmatprep.mubr.f32.mxu0 %v939_v31  ;;  %1303 = vmatpush3.bf16.msra.mxu0 %v1665_v61 }
  0x83   :  { %1305 = vmatprep.subr.bf16.mxu0 %v1670_v2 }
  0x85   :  { %1103 = vmatmul.mubr.f32.gmra.mrb[4].mxu0 %v940_v33 }
  0x86   :  { %1105 = vmatprep.mubr.f32.mxu0 %v943_v34  ;;  %1307 = vmatpush3.bf16.msra.mxu0 %v1670_v2 }
  0x87   :  { %1309 = vmatprep.subr.bf16.mxu0 %v1674_v8 }
  0x89   :  { %1106 = vmatmul.mubr.f32.gmra.mrb[6].mxu0 %v944_v36 }
  0x8a   :  { %1108 = vmatprep.mubr.f32.mxu0 %v947_v37  ;;  %1311 = vmatpush3.bf16.msra.mxu0 %v1674_v8  ;;  %v578_v37 = vld [vmem:[#allocation11 + $0x70] sm:$0xff] }
  0x8b   :  { %1313 = vmatprep.subr.bf16.mxu0 %v1678_v14  ;;  %v1292_v41 = vpack.c.bf16 %v579_v38, %v578_v37 }
  0x8d   :  { %1109 = vmatmul.mubr.f32.gmra.mrb[8].mxu0 %v948_v39  ;;  %v562_v39 = vld [vmem:[#allocation9 + $0x70] sm:$0xff]  ;;  %1293 = vmatprep.subr.bf16.mxu1 %v1292_v41 }
  0x8e   :  { %1111 = vmatprep.mubr.f32.mxu0 %v951_v40  ;;  %1315 = vmatpush3.bf16.msra.mxu0 %v1678_v14 }
  0x8f   :  { %1317 = vmatprep.subr.bf16.mxu0 %v1682_v20  ;;  %1295 = vmatpush3.bf16.msra.mxu1 %v1292_v41 }
  0x90   :  { %1328 = vmatprep.subr.bf16.mxu1 %v1663_v56 }
  0x91   :  { %1112 = vmatmul.mubr.f32.gmra.mrb[10].mxu0 %v952_v42  ;;  %v563_v42 = vld [vmem:[#allocation9 + $0x78] sm:$0xff] }
  0x92   :  { %1114 = vmatprep.mubr.f32.mxu0 %v955_v43  ;;  %1319 = vmatpush3.bf16.msra.mxu0 %v1682_v20  ;;  %v1715_v43 = vpack.c.bf16 %v563_v42, %v562_v39 }
  0x93   :  { %1321 = vmatprep.subr.bf16.mxu0 %v1686_v26 }
  0x95   :  { %1115 = vmatmul.mubr.f32.gmra.mrb[12].mxu0 %v956_v45 }
  0x96   :  { %1117 = vmatprep.mubr.f32.mxu0 %v959_v46  ;;  %1323 = vmatpush3.bf16.msra.mxu0 %v1686_v26 }
  0x97   :  { %1325 = vmatprep.subr.bf16.mxu0 %v1715_v43 }
  0x99   :  { %1118 = vmatmul.mubr.f32.gmra.mrb[14].mxu0 %v960_v47 }
  0x9a   :  { %1327 = vmatpush3.bf16.msra.mxu0 %v1715_v43  ;;  %1208 = vmatprep.mubr.f32.mxu0 %v532_v50 }
  0x9d   :  { %1209 = vmatmul.mubr.f32.vlgmr.msra.gmra.mrb[16].mxu0 %v533_v53 }
  0x9e   :  { %1211 = vmatprep.mubr.f32.mxu0 %v534_v59 }
  0xa1   :  { %1212 = vmatmul.mubr.f32.gmra.mrb[18].mxu0 %v535_v63  ;;  %v540_v63 = vld [vmem:[#allocation8 + $0x40] sm:$0xff] }
  0xa2   :  { %1214 = vmatprep.mubr.f32.mxu0 %v536_v5 }
  0xa5   :  { %1215 = vmatmul.mubr.f32.gmra.mrb[20].mxu0 %v537_v9 }
  0xa6   :  { %1217 = vmatprep.mubr.f32.mxu0 %v538_v15  ;;  %v928_v15 = vld [vmem:[%s1814_s5] ss:$0 sm:$0xff]  ;;  %s1555_s5 = smov [#allocation12]  }
  0xa7   :  { %s914_s12 = sshll.u32 %s1555_s5, 4  ;;  %s915_s12 = int_to_ptr.vmem [resolvable:$true] %s914_s12 }
  0xa8   :  { %s1515_s13 = scalar_lea.vmem %s915_s12, 2048  ;;  %p1520_p13 = scmp.lt.s32.totalorder %s915_s12, %s915_s12 }
  0xa9   :  { %1218 = vmatmul.mubr.f32.gmra.mrb[22].mxu0 %v539_v17  ;;  %p1516_p12 = scmp.ne.s32.totalorder %s915_s12, %s1515_s13  ;;  %p1521_p0 = scmp.lt.s32.totalorder %s1515_s13, %s1515_s13 }
  0xab   :  { %p1522_p1 = por %p1521_p0, %p1520_p13 }
  0xad   :  { %p1523_p2 = pnand %p1522_p1, %p1516_p12 }
 0x150   :  { %v1691_v27 = vpop.f32.mrb[0].mxu0 }
 0x151   :  { %v1693_v28 = vpop.f32.mrb[1].mxu0  ;;  %vm373_vm1 = vcmp.gt.f32.partialorder %v1691_v27, 0.0 }
 0x152   :  { %1373 = vrcp.f32 %v1693_v28  ;;  %vm372_vm0 = vcmp.gt.f32.partialorder %v1693_v28, 0.0 }
 0x153   :  { %1375 = vrcp.f32 %v1691_v27 }
 0x154   :  { %v1697_v29 = vpop.f32.mrb[2].mxu0 }
 0x155   :  { %v1699_v30 = vpop.f32.mrb[3].mxu0  ;;  %vm375_vm3 = vcmp.gt.f32.partialorder %v1697_v29, 0.0 }
 0x156   :  { %1377 = vrcp.f32 %v1699_v30  ;;  %vm374_vm2 = vcmp.gt.f32.partialorder %v1699_v30, 0.0 }
 0x157   :  { %1379 = vrcp.f32 %v1697_v29 }
 0x158   :  { %v1703_v31 = vpop.f32.mrb[4].mxu0 }
 0x159   :  { %v1705_v32 = vpop.f32.mrb[5].mxu0  ;;  %vm377_vm5 = vcmp.gt.f32.partialorder %v1703_v31, 0.0 }
 0x15a   :  { %1381 = vrcp.f32 %v1705_v32  ;;  %vm376_vm4 = vcmp.gt.f32.partialorder %v1705_v32, 0.0 }
 0x15b   :  { %1383 = vrcp.f32 %v1703_v31 }
 0x15c   :  { %v1374_v33 = vpop.eup %1373  ;;  %v1709_v34 = vpop.f32.mrb[6].mxu0 }
 0x15d   :  { %v1712_v35 = vpop.f32.mrb[7].mxu0  ;;  %v420_v36 = vsel %vm372_vm0, %v1374_v33, 0.0  ;;  %v1376_v40 = vpop.eup %1375  ;;  %vm379_vm7 = vcmp.gt.f32.partialorder %v1709_v34, 0.0 }
 0x15e   :  { %1385 = vrcp.f32 %v1712_v35  ;;  %438 = vperm.xlu0 %1371, %v420_v36   ;;  %v421_v47 = vsel %vm373_vm1, %v1376_v40, 0.0  ;;  %vm378_vm6 = vcmp.gt.f32.partialorder %v1712_v35, 0.0 }
 0x15f   :  { %1387 = vrcp.f32 %v1709_v34 }
 0x160   :  { %v1378_v44 = vpop.eup %1377  ;;  %v1718_v45 = vpop.f32.mrb[8].mxu0 }
 0x161   :  { %v1722_v46 = vpop.f32.mrb[9].mxu0  ;;  %v422_v48 = vsel %vm374_vm2, %v1378_v44, 0.0  ;;  %v1380_v49 = vpop.eup %1379  ;;  %vm381_vm9 = vcmp.gt.f32.partialorder %v1718_v45, 0.0 }
 0x162   :  { %1389 = vrcp.f32 %v1722_v46  ;;  %443 = vperm.xlu0 %1371, %v421_v47   ;;  %448 = vperm.xlu1 %1372, %v422_v48   ;;  %v423_v55 = vsel %vm375_vm3, %v1380_v49, 0.0  ;;  %vm380_vm8 = vcmp.gt.f32.partialorder %v1722_v46, 0.0 }
 0x163   :  { %1391 = vrcp.f32 %v1718_v45 }
 0x164   :  { %v1382_v51 = vpop.eup %1381  ;;  %v1729_v52 = vpop.f32.mrb[10].mxu0 }
 0x165   :  { %v1733_v54 = vpop.f32.mrb[11].mxu0  ;;  %v424_v57 = vsel %vm376_vm4, %v1382_v51, 0.0  ;;  %v1384_v58 = vpop.eup %1383  ;;  %vm383_vm11 = vcmp.gt.f32.partialorder %v1729_v52, 0.0 }
 0x166   :  { %1393 = vrcp.f32 %v1733_v54  ;;  %453 = vperm.xlu1 %1372, %v423_v55   ;;  %458 = vperm.xlu0 %1371, %v424_v57   ;;  %v425_v1 = vsel %vm377_vm5, %v1384_v58, 0.0  ;;  %vm382_vm10 = vcmp.gt.f32.partialorder %v1733_v54, 0.0 }
 0x167   :  { %1395 = vrcp.f32 %v1729_v52 }
 0x168   :  { %v1386_v60 = vpop.eup %1385  ;;  %v1737_v62 = vpop.f32.mrb[12].mxu0 }
 0x169   :  { %v1741_v0 = vpop.f32.mrb[13].mxu0  ;;  %v426_v3 = vsel %vm378_vm6, %v1386_v60, 0.0  ;;  %v1388_v4 = vpop.eup %1387  ;;  %vm385_vm13 = vcmp.gt.f32.partialorder %v1737_v62, 0.0 }
 0x16a   :  { %1397 = vrcp.f32 %v1741_v0  ;;  %463 = vperm.xlu1 %1372, %v425_v1   ;;  %468 = vperm.xlu0 %1371, %v426_v3   ;;  %v427_v11 = vsel %vm379_vm7, %v1388_v4, 0.0  ;;  %vm384_vm12 = vcmp.gt.f32.partialorder %v1741_v0, 0.0  ;;  %v544_v1 = vld [vmem:[#allocation8 + $0x60] sm:$0xff]  ;;  %v546_v3 = vld [vmem:[#allocation8 + $0x70] sm:$0xff]  ;;  %v547_v4 = vld [vmem:[#allocation8 + $0x78] sm:$0xff] }
 0x16b   :  { %1399 = vrcp.f32 %v1737_v62 }
 0x16c   :  { %v1390_v6 = vpop.eup %1389  ;;  %v1745_v7 = vpop.f32.mrb[14].mxu0 }
 0x16d   :  { %v1749_v10 = vpop.f32.mrb[15].mxu0  ;;  %v428_v12 = vsel %vm380_vm8, %v1390_v6, 0.0  ;;  %v1392_v13 = vpop.eup %1391  ;;  %vm387_vm15 = vcmp.gt.f32.partialorder %v1745_v7, 0.0 }
 0x16e   :  { %1401 = vrcp.f32 %v1749_v10  ;;  %473 = vperm.xlu1 %1372, %v427_v11   ;;  %478 = vperm.xlu0 %1371, %v428_v12   ;;  %v429_v18 = vsel %vm381_vm9, %v1392_v13, 0.0  ;;  %vm386_vm14 = vcmp.gt.f32.partialorder %v1749_v10, 0.0 }
 0x16f   :  { %1403 = vrcp.f32 %v1745_v7 }
 0x170   :  { %v1394_v16 = vpop.eup %1393  ;;  %v1210_v5 = vpop.f32.mrb[16].mxu0 }
 0x171   :  { %v430_v19 = vsel %vm382_vm10, %v1394_v16, 0.0  ;;  %v1396_v21 = vpop.eup %1395  ;;  %v791_v6 = vpop.f32.mrb[17].mxu0 }
 0x172   :  { %483 = vperm.xlu1 %1372, %v429_v18   ;;  %488 = vperm.xlu0 %1371, %v430_v19   ;;  %v431_v23 = vsel %vm383_vm11, %v1396_v21, 0.0 }
 0x174   :  { %v1398_v22 = vpop.eup %1397 }
 0x175   :  { %v432_v24 = vsel %vm384_vm12, %v1398_v22, 0.0  ;;  %v1400_v25 = vpop.eup %1399 }
 0x176   :  { %493 = vperm.xlu1 %1372, %v431_v23   ;;  %498 = vperm.xlu0 %1371, %v432_v24   ;;  %v433_v36 = vsel %vm385_vm13, %v1400_v25, 0.0 }
 0x178   :  { %v1402_v33 = vpop.eup %1401 }
 0x179   :  { %v434_v37 = vsel %vm386_vm14, %v1402_v33, 0.0  ;;  %v1404_v38 = vpop.eup %1403 }
 0x17a   :  { %503 = vperm.xlu1 %1372, %v433_v36   ;;  %508 = vperm.xlu0 %1371, %v434_v37   ;;  %v435_v39 = vsel %vm387_vm15, %v1404_v38, 0.0 }
 0x17e   :  { %513 = vperm.xlu1 %1372, %v435_v39  }
 0x1dd   :  { %v439_v40 = vpop.permute.xlu0 %438 }
 0x1de   :  { %v516_v41 = vmul.f32 %v439_v40, %v1693_v28 }
 0x1e0   :  { %1152 = vmatprep.mubr.f32.mxu1 %v516_v41 }
 0x1e1   :  { %v444_v42 = vpop.permute.xlu0 %443  ;;  %v449_v44 = vpop.permute.xlu1 %448 }
 0x1e2   :  { %v517_v47 = vmul.f32 %v1691_v27, %v444_v42  ;;  %v518_v48 = vmul.f32 %v449_v44, %v1699_v30 }
 0x1e4   :  { %1153 = vmatmul.mubr.f32.vlgmr.msra.gmra.mrb[0].mxu1 %v517_v47 }
 0x1e5   :  { %1336 = vmatpush3.bf16.msra.mxu1 %v1663_v56  ;;  %1155 = vmatprep.mubr.f32.mxu1 %v518_v48  ;;  %v454_v49 = vpop.permute.xlu1 %453  ;;  %v459_v50 = vpop.permute.xlu0 %458 }
 0x1e6   :  { %v519_v51 = vmul.f32 %v1697_v29, %v454_v49  ;;  %v520_v53 = vmul.f32 %v459_v50, %v1705_v32  ;;  %1329 = vmatprep.subr.bf16.mxu1 %v1665_v61 }
 0x1e8   :  { %1156 = vmatmul.mubr.f32.gmra.mrb[2].mxu1 %v519_v51 }
 0x1e9   :  { %1337 = vmatpush3.bf16.msra.mxu1 %v1665_v61  ;;  %v464_v28 = vpop.permute.xlu1 %463  ;;  %1158 = vmatprep.mubr.f32.mxu1 %v520_v53  ;;  %v469_v27 = vpop.permute.xlu0 %468 }
 0x1ea   :  { %v521_v30 = vmul.f32 %v1703_v31, %v464_v28  ;;  %v522_v55 = vmul.f32 %v469_v27, %v1712_v35  ;;  %1330 = vmatprep.subr.bf16.mxu1 %v1670_v2 }
 0x1ec   :  { %1159 = vmatmul.mubr.f32.gmra.mrb[4].mxu1 %v521_v30 }
 0x1ed   :  { %1338 = vmatpush3.bf16.msra.mxu1 %v1670_v2  ;;  %v474_v56 = vpop.permute.xlu1 %473  ;;  %1161 = vmatprep.mubr.f32.mxu1 %v522_v55  ;;  %v479_v29 = vpop.permute.xlu0 %478 }
 0x1ee   :  { %v523_v32 = vmul.f32 %v1709_v34, %v474_v56  ;;  %v524_v57 = vmul.f32 %v479_v29, %v1722_v46  ;;  %1331 = vmatprep.subr.bf16.mxu1 %v1674_v8 }
 0x1f0   :  { %1162 = vmatmul.mubr.f32.gmra.mrb[6].mxu1 %v523_v32 }
 0x1f1   :  { %1339 = vmatpush3.bf16.msra.mxu1 %v1674_v8  ;;  %v484_v61 = vpop.permute.xlu1 %483  ;;  %1164 = vmatprep.mubr.f32.mxu1 %v524_v57  ;;  %v489_v31 = vpop.permute.xlu0 %488 }
 0x1f2   :  { %v525_v35 = vmul.f32 %v1718_v45, %v484_v61  ;;  %v526_v58 = vmul.f32 %v489_v31, %v1733_v54  ;;  %1332 = vmatprep.subr.bf16.mxu1 %v1678_v14 }
 0x1f4   :  { %1165 = vmatmul.mubr.f32.gmra.mrb[8].mxu1 %v525_v35 }
 0x1f5   :  { %1340 = vmatpush3.bf16.msra.mxu1 %v1678_v14  ;;  %v494_v2 = vpop.permute.xlu1 %493  ;;  %1167 = vmatprep.mubr.f32.mxu1 %v526_v58  ;;  %v499_v34 = vpop.permute.xlu0 %498 }
 0x1f6   :  { %v527_v46 = vmul.f32 %v1729_v52, %v494_v2  ;;  %v528_v59 = vmul.f32 %v499_v34, %v1741_v0  ;;  %1333 = vmatprep.subr.bf16.mxu1 %v1682_v20  ;;  %v543_v0 = vld [vmem:[#allocation8 + $0x58] sm:$0xff] }
 0x1f8   :  { %1168 = vmatmul.mubr.f32.gmra.mrb[10].mxu1 %v527_v46 }
 0x1f9   :  { %1341 = vmatpush3.bf16.msra.mxu1 %v1682_v20  ;;  %v504_v8 = vpop.permute.xlu1 %503  ;;  %1170 = vmatprep.mubr.f32.mxu1 %v528_v59  ;;  %v509_v45 = vpop.permute.xlu0 %508  ;;  %v541_v20 = vld [vmem:[#allocation8 + $0x48] sm:$0xff] }
 0x1fa   :  { %v529_v54 = vmul.f32 %v1737_v62, %v504_v8  ;;  %v530_v60 = vmul.f32 %v509_v45, %v1749_v10  ;;  %1334 = vmatprep.subr.bf16.mxu1 %v1686_v26  ;;  %v542_v62 = vld [vmem:[#allocation8 + $0x50] sm:$0xff] }
 0x1fc   :  { %1171 = vmatmul.mubr.f32.gmra.mrb[12].mxu1 %v529_v54 }
 0x1fd   :  { %1342 = vmatpush3.bf16.msra.mxu1 %v1686_v26  ;;  %v514_v14 = vpop.permute.xlu1 %513  ;;  %1173 = vmatprep.mubr.f32.mxu1 %v530_v60  ;;  %v545_v26 = vld [vmem:[#allocation8 + $0x68] sm:$0xff] }
 0x1fe   :  { %v531_v52 = vmul.f32 %v1745_v7, %v514_v14  ;;  %1335 = vmatprep.subr.bf16.mxu1 %v1715_v43  ;;  %v1213_v7 = vpop.f32.mrb[18].mxu0 }
 0x1ff   :  { %v801_v9 = vpop.f32.mrb[19].mxu0 }
 0x200   :  { %1174 = vmatmul.mubr.f32.gmra.mrb[14].mxu1 %v531_v52 }
 0x201   :  { %1343 = vmatpush3.bf16.msra.mxu1 %v1715_v43  ;;  %1220 = vmatprep.mubr.f32.mxu1 %v540_v63  ;;  %v1216_v43 = vpop.f32.mrb[20].mxu0 }
 0x202   :  { %v811_v10 = vpop.f32.mrb[21].mxu0 }
 0x203   :  { %v1219_v11 = vpop.f32.mrb[22].mxu0 }
 0x204   :  { %1221 = vmatmul.mubr.f32.vlgmr.msra.gmra.mrb[8].mxu1 %v541_v20  ;;  %v821_v12 = vpop.f32.mrb[23].mxu0 }
 0x205   :  { %1223 = vmatprep.mubr.f32.mxu1 %v542_v62 }
 0x208   :  { %1224 = vmatmul.mubr.f32.gmra.mrb[10].mxu1 %v543_v0 }
 0x209   :  { %1226 = vmatprep.mubr.f32.mxu1 %v544_v1 }
 0x20c   :  { %1227 = vmatmul.mubr.f32.gmra.mrb[12].mxu1 %v545_v26 }
 0x20d   :  { %1229 = vmatprep.mubr.f32.mxu1 %v546_v3 }
 0x210   :  { %1230 = vmatmul.mubr.f32.gmra.mrb[14].mxu1 %v547_v4 }
 0x2b7   :  { %v1154_v13 = vpop.f32.mrb[0].mxu1 }
 0x2b8   :  { %v797_v16 = vadd.f32 %v1210_v5, %v1154_v13  ;;  %v646_v17 = vpop.f32.mrb[1].mxu1 }
 0x2b9   :  { %v792_v18 = vadd.f32 %v791_v6, %v646_v17 }
 0x2ba   :  { %v878_v19 = vadd.f32 %v928_v15, %v797_v16 }
 0x2bb   :  { %v877_v21 = vadd.f32 %v928_v15, %v792_v18  ;;  %v1157_v22 = vpop.f32.mrb[2].mxu1 }
 0x2bc   :  { %894 = vst [vmem:[#allocation12 + $0x8] sm:$0xff] %v878_v19  ;;  %v807_v23 = vadd.f32 %v1213_v7, %v1157_v22  ;;  %v656_v24 = vpop.f32.mrb[3].mxu1 }
 0x2bd   :  { %893 = vst [vmem:[#allocation12] sm:$0xff] %v877_v21  ;;  %v802_v25 = vadd.f32 %v801_v9, %v656_v24 }
 0x2be   :  { %v880_v33 = vadd.f32 %v928_v15, %v807_v23 }
 0x2bf   :  { %v879_v36 = vadd.f32 %v928_v15, %v802_v25  ;;  %v1160_v37 = vpop.f32.mrb[4].mxu1 }
 0x2c0   :  { %896 = vst [vmem:[#allocation12 + $0x18] sm:$0xff] %v880_v33  ;;  %v817_v38 = vadd.f32 %v1216_v43, %v1160_v37  ;;  %v666_v39 = vpop.f32.mrb[5].mxu1 }
 0x2c1   :  { %895 = vst [vmem:[#allocation12 + $0x10] sm:$0xff] %v879_v36  ;;  %v812_v40 = vadd.f32 %v811_v10, %v666_v39 }
 0x2c2   :  { %v882_v41 = vadd.f32 %v928_v15, %v817_v38 }
 0x2c3   :  { %v881_v42 = vadd.f32 %v928_v15, %v812_v40  ;;  %v1163_v44 = vpop.f32.mrb[6].mxu1 }
 0x2c4   :  { %898 = vst [vmem:[#allocation12 + $0x28] sm:$0xff] %v882_v41  ;;  %v827_v47 = vadd.f32 %v1219_v11, %v1163_v44  ;;  %v676_v48 = vpop.f32.mrb[7].mxu1 }
 0x2c5   :  { %897 = vst [vmem:[#allocation12 + $0x20] sm:$0xff] %v881_v42  ;;  %v822_v49 = vadd.f32 %v821_v12, %v676_v48 }
 0x2c6   :  { %v884_v50 = vadd.f32 %v928_v15, %v827_v47 }
 0x2c7   :  { %v883_v51 = vadd.f32 %v928_v15, %v822_v49 }
 0x2c8   :  { %900 = vst [vmem:[#allocation12 + $0x38] sm:$0xff] %v884_v50 }
 0x2c9   :  { %899 = vst [vmem:[#allocation12 + $0x30] sm:$0xff] %v883_v51 }
 0x2d7   :  { %v1222_v53 = vpop.f32.mrb[8].mxu1 }
 0x2d8   :  { %v886_v28 = vadd.f32 %v1222_v53, %v928_v15  ;;  %v831_v27 = vpop.f32.mrb[9].mxu1 }
 0x2d9   :  { %v885_v30 = vadd.f32 %v928_v15, %v831_v27 }
 0x2da   :  { %902 = vst [vmem:[#allocation12 + $0x48] sm:$0xff] %v886_v28 }
 0x2db   :  { %901 = vst [vmem:[#allocation12 + $0x40] sm:$0xff] %v885_v30  ;;  %v1225_v55 = vpop.f32.mrb[10].mxu1 }
 0x2dc   :  { %v888_v56 = vadd.f32 %v1225_v55, %v928_v15  ;;  %v841_v29 = vpop.f32.mrb[11].mxu1 }
 0x2dd   :  { %v887_v32 = vadd.f32 %v928_v15, %v841_v29 }
 0x2de   :  { %904 = vst [vmem:[#allocation12 + $0x58] sm:$0xff] %v888_v56 }
 0x2df   :  { %903 = vst [vmem:[#allocation12 + $0x50] sm:$0xff] %v887_v32  ;;  %v1228_v57 = vpop.f32.mrb[12].mxu1 }
 0x2e0   :  { %v890_v61 = vadd.f32 %v1228_v57, %v928_v15  ;;  %v851_v31 = vpop.f32.mrb[13].mxu1 }
 0x2e1   :  { %v889_v35 = vadd.f32 %v928_v15, %v851_v31 }
 0x2e2   :  { %906 = vst [vmem:[#allocation12 + $0x68] sm:$0xff] %v890_v61 }
 0x2e3   :  { %905 = vst [vmem:[#allocation12 + $0x60] sm:$0xff] %v889_v35  ;;  %v1231_v58 = vpop.f32.mrb[14].mxu1 }
 0x2e4   :  { %v892_v2 = vadd.f32 %v1231_v58, %v928_v15  ;;  %v861_v34 = vpop.f32.mrb[15].mxu1 }
 0x2e5   :  { %v891_v46 = vadd.f32 %v928_v15, %v861_v34 }
 0x2e6   :  { %908 = vst [vmem:[#allocation12 + $0x78] sm:$0xff] %v892_v2 }
 0x2e7   :  { %907 = vst [vmem:[#allocation12 + $0x70] sm:$0xff] %v891_v46 }
 0x2e8   :  { %1526 = shalt.err (!%p1523_p2)
}
 0x2e9   :  { %s1527_s17 = scalar_lea.hbm %s1815_s6, 2048 }
 0x2ea   :  { %p1528_p3 = scmp.ne.s32.totalorder %s1815_s6, %s1527_s17  ;;  %p1531_p4 = scmp.lt.u32.totalorder %s1527_s17, %s1815_s6 }
 0x2ec   :  { %p1533_p5 = pnand %p1531_p4, %p1528_p3 }
 0x2ee   :  { %1536 = shalt.err (!%p1533_p5)
}
 0x2ef   :  { %920 = dma.vmem_to_hbm [thread:$0]  %s915_s12, 2048, %s1815_s6, [#allocation5], %s1546_s7, %s1546_s7, %s1547_s8  }
 0x2f0   :  { %1543 = dma.done.wait [#allocation5], 2048  }
 0x2f1   :  { %1544 = vsyncadd [#allocation5], 4294965248 }
 0x2f2   :  { %924 = vsyncpa [#allocation4], 1 }
 0x2f3   :  { %925 = vsyncpa [#allocation7], 1 }
 0x2f4   :  { %926 = vsyncpa [#allocation10], 1 }
 0x2f5   :  { %927 = vsyncpa [#allocation5], 1 }

</bundles_post_ra>
